<compile_context>
chip_gen: v6e
topology: v6e:2x2x1
jax: 0.10.0
libtpu: 0.0.40
codegen_flags: <defaults>
</compile_context>

<pallas_src>
import functools

import jax
import jax.numpy as jnp
from jax.experimental import pallas as pl
from jax.experimental.pallas import tpu as pltpu


def _discriminator_kernel(obs_t_ref, act_t_ref,
                          w1o_ref, w1a_ref, b1_ref,
                          w2_ref, b2_ref,
                          w3_ref, b3_ref,
                          out_ref, *, hidden_dtype):
    # Layer 1 (fused concat, feature-major):
    #   (h0, obs_dim) @ (obs_dim, tb) + (h0, act_dim) @ (act_dim, tb) + b1
    h = (jnp.dot(w1o_ref[...], obs_t_ref[...],
                 preferred_element_type=jnp.float32)
         + jnp.dot(w1a_ref[...], act_t_ref[...],
                   preferred_element_type=jnp.float32)
         + b1_ref[...])
    h = jnp.tanh(h.astype(hidden_dtype))

    # Layer 2: (h1, h0) @ (h0, tb) + b2
    h = (jnp.dot(w2_ref[...].astype(hidden_dtype), h,
                 preferred_element_type=jnp.float32)
         + b2_ref[...])
    h = jnp.tanh(h.astype(hidden_dtype))

    # Output head: (1, h1) @ (h1, tb) -> lane-dense (1, tb) logit.
    logit = (jnp.dot(w3_ref[...].astype(hidden_dtype), h,
                     preferred_element_type=jnp.float32)
             + b3_ref[...])

    # sigmoid(x) = 0.5 * (tanh(x/2) + 1): EUP-only epilogue, no inf intermediate.
    out_ref[...] = 0.5 * (jnp.tanh(0.5 * logit) + 1.0)


@functools.partial(jax.jit, static_argnames=("block_b", "use_bf16_hidden"))
def discriminator_forward(obs, act, params, *, block_b=2048,
                          use_bf16_hidden=False):
    """Fused Discriminator forward. obs:[B,obs_dim], act:[B,act_dim] -> D:[B]."""
    B, obs_dim = obs.shape
    act_dim = act.shape[1]

    # Feature-major ("batch-in-lanes") layout for the kernel.
    obs_t = obs.T            # (obs_dim, B)
    act_t = act.T            # (act_dim, B)

    # Batch tile: multiple of 128 on the lane axis (unless it spans the whole
    # batch), and >=2 grid steps on larger batches so both v7x TensorCores
    # get work.
    if B <= 256:
        tb = B
    else:
        half = -(-B // 2)                 # cdiv(B, 2)
        half = -(-half // 128) * 128      # round up to lane multiple
        tb = max(128, min(block_b, half))
    grid = (pl.cdiv(B, tb),)

    hidden_dtype = jnp.bfloat16 if use_bf16_hidden else jnp.float32

    # Batch-tiled (feature-major) arrays: lane-axis block index advances.
    def feat_spec(feat):
        return pl.BlockSpec((feat, tb), lambda i: (0, i))

    # Weights/biases: full array, constant block index -> VMEM-resident.
    def resident(arr):
        return pl.BlockSpec(arr.shape, lambda i: (0, 0))

    out = pl.pallas_call(
        functools.partial(_discriminator_kernel, hidden_dtype=hidden_dtype),
        out_shape=jax.ShapeDtypeStruct((1, B), jnp.float32),
        grid=grid,
        in_specs=[
            feat_spec(obs_dim),
            feat_spec(act_dim),
            resident(params["w1_obs"]),
            resident(params["w1_act"]),
            resident(params["b1"]),
            resident(params["w2"]),
            resident(params["b2"]),
            resident(params["w3"]),
            resident(params["b3"]),
        ],
        out_specs=pl.BlockSpec((1, tb), lambda i: (0, i)),
        compiler_params=pltpu.CompilerParams(
            dimension_semantics=("parallel",)),
    )(obs_t, act_t,
      params["w1_obs"], params["w1_act"], params["b1"],
      params["w2"], params["b2"],
      params["w3"], params["b3"])
    return out[0]


def init_params(key, obs_dim, act_dim, hidden_sizes):
    """PyTorch nn.Linear default init (U(-1/sqrt(fan_in), 1/sqrt(fan_in))).

    Weights kept in PyTorch's native [out, in] layout (feature-major for the
    kernel); biases as [out, 1]; W1 split column-wise into obs / act halves.
    """
    h0, h1 = hidden_sizes[0], hidden_sizes[-1]
    in_dim = obs_dim + act_dim
    k1, k2, k3 = jax.random.split(key, 3)

    def linear_init(k, fan_in, fan_out):
        kw, kb = jax.random.split(k)
        bound = float(1.0 / (fan_in ** 0.5))
        w = jax.random.uniform(kw, (fan_out, fan_in), jnp.float32, -bound, bound)
        b = jax.random.uniform(kb, (fan_out, 1), jnp.float32, -bound, bound)
        return w, b

    w1, b1 = linear_init(k1, in_dim, h0)
    w2, b2 = linear_init(k2, h0, h1)
    w3, b3 = linear_init(k3, h1, 1)
    return {
        "w1_obs": w1[:, :obs_dim],   # columns of W1 that multiply obs
        "w1_act": w1[:, obs_dim:],   # columns of W1 that multiply act
        "b1": b1,
        "w2": w2, "b2": b2,
        "w3": w3, "b3": b3,
    }


def _reference(obs, act, p):
    hp = jax.lax.Precision.HIGHEST
    x = jnp.concatenate([obs, act], axis=-1)
    w1 = jnp.concatenate([p["w1_obs"], p["w1_act"]], axis=1)   # (h0, in_dim)
    h = jnp.tanh(jnp.dot(x, w1.T, precision=hp) + p["b1"][:, 0])
    h = jnp.tanh(jnp.dot(h, p["w2"].T, precision=hp) + p["b2"][:, 0])
    logit = jnp.dot(h, p["w3"].T, precision=hp) + p["b3"][:, 0]
    return jax.nn.sigmoid(logit)[:, 0]


if __name__ == "__main__":
    key = jax.random.PRNGKey(0)
    k_obs, k_act, k_par, k_big = jax.random.split(key, 4)

    B, obs_dim, act_dim = 2, 8, 4
    hidden_sizes = (64, 64)

    obs = jax.random.normal(k_obs, (B, obs_dim), dtype=jnp.float32)
    act = jax.random.normal(k_act, (B, act_dim), dtype=jnp.float32)
    params = init_params(k_par, obs_dim, act_dim, hidden_sizes)

    # Small-batch path (single full block, tb == B).
    d = discriminator_forward(obs, act, params)
    jax.block_until_ready(d)
    assert d.shape == (B,)
    assert bool(jnp.all((d > 0.0) & (d < 1.0)))
    assert jnp.allclose(d, _reference(obs, act, params), atol=1e-4)

    # Multi-tile grid path (>=2 grid steps, partial last tile).
    Bb = 300
    kb1, kb2 = jax.random.split(k_big)
    obs_b = jax.random.normal(kb1, (Bb, obs_dim), dtype=jnp.float32)
    act_b = jax.random.normal(kb2, (Bb, act_dim), dtype=jnp.float32)
    d_b = discriminator_forward(obs_b, act_b, params, block_b=128)
    jax.block_until_ready(d_b)
    assert d_b.shape == (Bb,)
    assert jnp.allclose(d_b, _reference(obs_b, act_b, params), atol=1e-4)

    # bf16-hidden fast path (v6e/v7x EUP/MXU win; still correct elsewhere).
    d_bf = discriminator_forward(obs_b, act_b, params, block_b=128,
                                 use_bf16_hidden=True)
    jax.block_until_ready(d_bf)
    assert d_bf.shape == (Bb,)
    assert jnp.allclose(d_bf, _reference(obs_b, act_b, params), atol=3e-2)

    print("KERNEL_OK")
</pallas_src>

<mosaic_0001>
module attributes {stable_mosaic.version = 11 : i64} {
  func.func @_discriminator_kernel(%arg0: i32, %arg1: memref<8x2xf32, #tpu.memory_space<vmem>>, %arg2: memref<4x2xf32, #tpu.memory_space<vmem>>, %arg3: memref<64x8xf32, #tpu.memory_space<vmem>>, %arg4: memref<64x4xf32, #tpu.memory_space<vmem>>, %arg5: memref<64x1xf32, #tpu.memory_space<vmem>>, %arg6: memref<64x64xf32, #tpu.memory_space<vmem>>, %arg7: memref<64x1xf32, #tpu.memory_space<vmem>>, %arg8: memref<1x64xf32, #tpu.memory_space<vmem>>, %arg9: memref<1x1xf32, #tpu.memory_space<vmem>>, %arg10: memref<1x2xf32, #tpu.memory_space<vmem>>) attributes {dimension_semantics = [#tpu.dimension_semantics<parallel>], iteration_bounds = array<i64: 1>, scalar_prefetch = 0 : i64, scratch_operands = 0 : i64, tpu.core_type = #tpu.core_type<tc>, window_params = [{transform_indices = @transform_0, window_bounds = array<i64: 8, 2>}, {transform_indices = @transform_1, window_bounds = array<i64: 4, 2>}, {pipeline_mode = #tpu.pipeline_mode<synchronous>, transform_indices = @transform_2, window_bounds = array<i64: 64, 8>}, {pipeline_mode = #tpu.pipeline_mode<synchronous>, transform_indices = @transform_3, window_bounds = array<i64: 64, 4>}, {pipeline_mode = #tpu.pipeline_mode<synchronous>, transform_indices = @transform_4, window_bounds = array<i64: 64, 1>}, {pipeline_mode = #tpu.pipeline_mode<synchronous>, transform_indices = @transform_5, window_bounds = array<i64: 64, 64>}, {pipeline_mode = #tpu.pipeline_mode<synchronous>, transform_indices = @transform_6, window_bounds = array<i64: 64, 1>}, {pipeline_mode = #tpu.pipeline_mode<synchronous>, transform_indices = @transform_7, window_bounds = array<i64: 1, 64>}, {pipeline_mode = #tpu.pipeline_mode<synchronous>, transform_indices = @transform_8, window_bounds = array<i64: 1, 1>}, {transform_indices = @transform_9, window_bounds = array<i64: 1, 2>}]} {
    %c0 = arith.constant 0 : index
    %c0_0 = arith.constant 0 : index
    %0 = vector.load %arg3[%c0, %c0_0] : memref<64x8xf32, #tpu.memory_space<vmem>>, vector<64x8xf32>
    %c0_1 = arith.constant 0 : index
    %c0_2 = arith.constant 0 : index
    %1 = vector.load %arg1[%c0_1, %c0_2] : memref<8x2xf32, #tpu.memory_space<vmem>>, vector<8x2xf32>
    %cst = arith.constant dense<0.000000e+00> : vector<64x2xf32>
    %2 = tpu.matmul %0, %1, %cst {dimension_numbers = #tpu.dot_dimension_numbers<[1], [0], [0], [1], [0, 0, 1, 1], [], []>} : vector<64x8xf32>, vector<8x2xf32>, vector<64x2xf32> -> vector<64x2xf32>
    %c0_3 = arith.constant 0 : index
    %c0_4 = arith.constant 0 : index
    %3 = vector.load %arg4[%c0_3, %c0_4] : memref<64x4xf32, #tpu.memory_space<vmem>>, vector<64x4xf32>
    %c0_5 = arith.constant 0 : index
    %c0_6 = arith.constant 0 : index
    %4 = vector.load %arg2[%c0_5, %c0_6] : memref<4x2xf32, #tpu.memory_space<vmem>>, vector<4x2xf32>
    %cst_7 = arith.constant dense<0.000000e+00> : vector<64x2xf32>
    %5 = tpu.matmul %3, %4, %cst_7 {dimension_numbers = #tpu.dot_dimension_numbers<[1], [0], [0], [1], [0, 0, 1, 1], [], []>} : vector<64x4xf32>, vector<4x2xf32>, vector<64x2xf32> -> vector<64x2xf32>
    %6 = arith.addf %2, %5 : vector<64x2xf32>
    %c0_8 = arith.constant 0 : index
    %c0_9 = arith.constant 0 : index
    %7 = vector.load %arg5[%c0_8, %c0_9] : memref<64x1xf32, #tpu.memory_space<vmem>>, vector<64x1xf32>
    %8 = vector.broadcast %7 : vector<64x1xf32> to vector<64x2xf32>
    %9 = arith.addf %6, %8 : vector<64x2xf32>
    %10 = math.tanh %9 : vector<64x2xf32>
    %c0_10 = arith.constant 0 : index
    %c0_11 = arith.constant 0 : index
    %11 = vector.load %arg6[%c0_10, %c0_11] : memref<64x64xf32, #tpu.memory_space<vmem>>, vector<64x64xf32>
    %cst_12 = arith.constant dense<0.000000e+00> : vector<64x2xf32>
    %12 = tpu.matmul %11, %10, %cst_12 {dimension_numbers = #tpu.dot_dimension_numbers<[1], [0], [0], [1], [0, 0, 1, 1], [], []>} : vector<64x64xf32>, vector<64x2xf32>, vector<64x2xf32> -> vector<64x2xf32>
    %c0_13 = arith.constant 0 : index
    %c0_14 = arith.constant 0 : index
    %13 = vector.load %arg7[%c0_13, %c0_14] : memref<64x1xf32, #tpu.memory_space<vmem>>, vector<64x1xf32>
    %14 = vector.broadcast %13 : vector<64x1xf32> to vector<64x2xf32>
    %15 = arith.addf %12, %14 : vector<64x2xf32>
    %16 = math.tanh %15 : vector<64x2xf32>
    %c0_15 = arith.constant 0 : index
    %c0_16 = arith.constant 0 : index
    %17 = vector.load %arg8[%c0_15, %c0_16] : memref<1x64xf32, #tpu.memory_space<vmem>>, vector<1x64xf32>
    %cst_17 = arith.constant dense<0.000000e+00> : vector<1x2xf32>
    %18 = tpu.matmul %17, %16, %cst_17 {dimension_numbers = #tpu.dot_dimension_numbers<[1], [0], [0], [1], [0, 0, 1, 1], [], []>} : vector<1x64xf32>, vector<64x2xf32>, vector<1x2xf32> -> vector<1x2xf32>
    %c0_18 = arith.constant 0 : index
    %c0_19 = arith.constant 0 : index
    %19 = vector.load %arg9[%c0_18, %c0_19] : memref<1x1xf32, #tpu.memory_space<vmem>>, vector<1x1xf32>
    %20 = vector.broadcast %19 : vector<1x1xf32> to vector<1x2xf32>
    %21 = arith.addf %18, %20 : vector<1x2xf32>
    %cst_20 = arith.constant 5.000000e-01 : f32
    %22 = vector.broadcast %cst_20 : f32 to vector<1x2xf32>
    %23 = arith.mulf %22, %21 : vector<1x2xf32>
    %24 = math.tanh %23 : vector<1x2xf32>
    %cst_21 = arith.constant 1.000000e+00 : f32
    %25 = vector.broadcast %cst_21 : f32 to vector<1x2xf32>
    %26 = arith.addf %24, %25 : vector<1x2xf32>
    %cst_22 = arith.constant 5.000000e-01 : f32
    %27 = vector.broadcast %cst_22 : f32 to vector<1x2xf32>
    %28 = arith.mulf %27, %26 : vector<1x2xf32>
    %c0_23 = arith.constant 0 : index
    %c0_24 = arith.constant 0 : index
    %29 = vector.load %arg10[%c0_23, %c0_24] : memref<1x2xf32, #tpu.memory_space<vmem>>, vector<1x2xf32>
    tpu.vector_store %arg10[%c0_23, %c0_24], %28 {strides = array<i32>} : memref<1x2xf32, #tpu.memory_space<vmem>>, vector<1x2xf32>,
    return
  }
  func.func @transform_0(%arg0: i32) -> (i32, i32) {
    %c0_i32 = arith.constant 0 : i32
    %c0_i32_0 = arith.constant 0 : i32
    return %c0_i32, %arg0 : i32, i32
  }
  func.func @transform_1(%arg0: i32) -> (i32, i32) {
    %c0_i32 = arith.constant 0 : i32
    %c0_i32_0 = arith.constant 0 : i32
    return %c0_i32, %arg0 : i32, i32
  }
  func.func @transform_2(%arg0: i32) -> (i32, i32) {
    %c0_i32 = arith.constant 0 : i32
    %c0_i32_0 = arith.constant 0 : i32
    %c0_i32_1 = arith.constant 0 : i32
    return %c0_i32, %c0_i32_0 : i32, i32
  }
  func.func @transform_3(%arg0: i32) -> (i32, i32) {
    %c0_i32 = arith.constant 0 : i32
    %c0_i32_0 = arith.constant 0 : i32
    %c0_i32_1 = arith.constant 0 : i32
    return %c0_i32, %c0_i32_0 : i32, i32
  }
  func.func @transform_4(%arg0: i32) -> (i32, i32) {
    %c0_i32 = arith.constant 0 : i32
    %c0_i32_0 = arith.constant 0 : i32
    %c0_i32_1 = arith.constant 0 : i32
    return %c0_i32, %c0_i32_0 : i32, i32
  }
  func.func @transform_5(%arg0: i32) -> (i32, i32) {
    %c0_i32 = arith.constant 0 : i32
    %c0_i32_0 = arith.constant 0 : i32
    %c0_i32_1 = arith.constant 0 : i32
    return %c0_i32, %c0_i32_0 : i32, i32
  }
  func.func @transform_6(%arg0: i32) -> (i32, i32) {
    %c0_i32 = arith.constant 0 : i32
    %c0_i32_0 = arith.constant 0 : i32
    %c0_i32_1 = arith.constant 0 : i32
    return %c0_i32, %c0_i32_0 : i32, i32
  }
  func.func @transform_7(%arg0: i32) -> (i32, i32) {
    %c0_i32 = arith.constant 0 : i32
    %c0_i32_0 = arith.constant 0 : i32
    %c0_i32_1 = arith.constant 0 : i32
    return %c0_i32, %c0_i32_0 : i32, i32
  }
  func.func @transform_8(%arg0: i32) -> (i32, i32) {
    %c0_i32 = arith.constant 0 : i32
    %c0_i32_0 = arith.constant 0 : i32
    %c0_i32_1 = arith.constant 0 : i32
    return %c0_i32, %c0_i32_0 : i32, i32
  }
  func.func @transform_9(%arg0: i32) -> (i32, i32) {
    %c0_i32 = arith.constant 0 : i32
    %c0_i32_0 = arith.constant 0 : i32
    return %c0_i32, %arg0 : i32, i32
  }
}

</mosaic_0001>

<bundles_post_ra>
// kernel: discriminator_forward.1
= control target key start
LH: loop header
LB: loop body
LE: loop exit
PB: predicated region body
PF: predicated region fallthrough
CT: control target
= control target key end

     0   :  { %s1099_s0 = inlined_call_operand.vmem [shape: f32[8,2], index: 0, kind: input, shape index: {}]   ;;  %s1100_s1 = inlined_call_operand.vmem [shape: f32[4,2], index: 1, kind: input, shape index: {}]   ;;  %s1101_s2 = inlined_call_operand.vmem [shape: f32[64,8], index: 2, kind: input, shape index: {}]   ;;  %s1102_s3 = inlined_call_operand.vmem [shape: f32[64,4], index: 3, kind: input, shape index: {}]   ;;  %s1103_s4 = inlined_call_operand.vmem [shape: f32[64,1], index: 4, kind: input, shape index: {}]   ;;  %s1104_s5 = inlined_call_operand.vmem [shape: f32[64,64], index: 5, kind: input, shape index: {}]   ;;  %s1105_s6 = inlined_call_operand.vmem [shape: f32[64,1], index: 6, kind: input, shape index: {}]   ;;  %s1106_s7 = inlined_call_operand.vmem [shape: f32[1,64], index: 7, kind: input, shape index: {}]   ;;  %s1107_s8 = inlined_call_operand.<no memory space> [shape: f32[1,1], index: 8, kind: input, shape index: {}]   ;;  %s1108_s9 = inlined_call_operand.hbm [shape: f32[1,2], index: 9, kind: output, shape index: {}]  }
   0x1   :  { %v14_v0 = vstv %s1107_s8 }
   0x2   :  { %15 = vst [vmem:[#allocation2] sm:$0x1] %v14_v0 }
   0x3   :  { %v52_v1 = vld [vmem:[%s1100_s1] sm:$0xf]  ;;  %vm78_vm0 = vcmask 1043456   ;;  %vm53_vm1 = vcmask 31744   ;;  %vm187_vm2 = vcmask 64512   ;;  %v45_v5 = vld [vmem:[%s1102_s3 + $0x8] sm:$0xff] }
   0x4   :  { %v43_v2 = vld [vmem:[%s1099_s0] sm:$0xff]  ;;  %748 = vmatprep.subr.msk.mxu0 %vm78_vm0, %v52_v1  ;;  %v36_v6 = vld [vmem:[%s1101_s2 + $0x8] sm:$0xff]  ;;  %v46_v7 = vld [vmem:[%s1102_s3 + $0x10] sm:$0xff]  ;;  %v885_v13 = vmov 0  }
   0x5   :  { %v44_v3 = vld [vmem:[%s1102_s3] sm:$0xff]  ;;  %762 = vmatprep.subr.mxu1 %v43_v2  ;;  %749 = vmatpush3.msk.msra.mxu0 %vm78_vm0, %v52_v1  ;;  %v37_v8 = vld [vmem:[%s1101_s2 + $0x10] sm:$0xff]  ;;  %v47_v9 = vld [vmem:[%s1102_s3 + $0x18] sm:$0xff] }
   0x6   :  { %v35_v4 = vld [vmem:[%s1101_s2] sm:$0xff]  ;;  %750 = vmatprep.mubr.msk.f32.mxu0 %vm53_vm1, %v44_v3  ;;  %763 = vmatpush3.msra.mxu1 %v43_v2  ;;  %v38_v10 = vld [vmem:[%s1101_s2 + $0x18] sm:$0xff]  ;;  %v322_v15 = vld [vmem:[%s1103_s4 + $0x28] sm:$0xff] }
   0x7   :  { %764 = vmatprep.mubr.msk.f32.mxu1 %vm187_vm2, %v35_v4  ;;  %751 = vmatmul.mubr.msk.f32.vlgmr.msra.gmra.mxu0 %vm53_vm1, %v45_v5  ;;  %v48_v11 = vld [vmem:[%s1102_s3 + $0x20] sm:$0xff]  ;;  %v324_v14 = vld [vmem:[%s1103_s4 + $0x38] sm:$0xff]  ;;  %v323_v16 = vld [vmem:[%s1103_s4 + $0x30] sm:$0xff] }
   0x8   :  { %765 = vmatmul.mubr.msk.f32.vlgmr.msra.gmra.mxu1 %vm187_vm2, %v36_v6  ;;  %753 = vmatprep.mubr.msk.f32.mxu0 %vm53_vm1, %v46_v7  ;;  %v39_v12 = vld [vmem:[%s1101_s2 + $0x20] sm:$0xff]  ;;  %v49_v18 = vld [vmem:[%s1102_s3 + $0x28] sm:$0xff]  ;;  %v50_v20 = vld [vmem:[%s1102_s3 + $0x30] sm:$0xff] }
   0x9   :  { %767 = vmatprep.mubr.msk.f32.mxu1 %vm187_vm2, %v37_v8  ;;  %827 = vset.pattern.permute.xlu0 %v885_v13  ;;  %v321_v17 = vld [vmem:[%s1103_s4 + $0x20] sm:$0xff]  ;;  %v40_v19 = vld [vmem:[%s1101_s2 + $0x28] sm:$0xff]  ;;  %v41_v21 = vld [vmem:[%s1101_s2 + $0x30] sm:$0xff] }
   0xa   :  { %828 = vset.pattern.permute.xlu1 %v885_v13  ;;  %362 = vperm.xlu0 %827, %v324_v14  }
   0xb   :  { %352 = vperm.xlu1 %828, %v322_v15   ;;  %754 = vmatmul.mubr.msk.f32.gmra.mxu0 %vm53_vm1, %v47_v9 }
   0xc   :  { %768 = vmatmul.mubr.msk.f32.gmra.mxu1 %vm187_vm2, %v38_v10  ;;  %756 = vmatprep.mubr.msk.f32.mxu0 %vm53_vm1, %v48_v11 }
   0xd   :  { %770 = vmatprep.mubr.msk.f32.mxu1 %vm187_vm2, %v39_v12 }
   0xe   :  { %357 = vperm.xlu0 %827, %v323_v16  }
   0xf   :  { %347 = vperm.xlu1 %828, %v321_v17  }
  0x10   :  { %16 = vsyncpa [#allocation4], 0  ;;  %757 = vmatmul.mubr.msk.f32.gmra.mxu0 %vm53_vm1, %v49_v18  ;;  %771 = vmatmul.mubr.msk.f32.gmra.mxu1 %vm187_vm2, %v40_v19  ;;  %v320_v22 = vld [vmem:[%s1103_s4 + $0x18] sm:$0xff]  ;;  %v319_v23 = vld [vmem:[%s1103_s4 + $0x10] sm:$0xff]  ;;  %vm437_vm3 = vcmask 523264   ;;  %vm887_vm4 = vmmov 0  }
  0x11   :  { %759 = vmatprep.mubr.msk.f32.mxu0 %vm53_vm1, %v50_v20  ;;  %773 = vmatprep.mubr.msk.f32.mxu1 %vm187_vm2, %v41_v21  ;;  %v51_v24 = vld [vmem:[%s1102_s3 + $0x38] sm:$0xff]  ;;  %v318_v26 = vld [vmem:[%s1103_s4 + $0x8] sm:$0xff]  ;;  %v317_v27 = vld [vmem:[%s1103_s4] sm:$0xff]  ;;  %s888_s18 = smov [#allocation3]   ;;  %vm663_vm5 = vcmask 8192  }
  0x12   :  { %v42_v25 = vld [vmem:[%s1101_s2 + $0x38] sm:$0xff]  ;;  %342 = vperm.xlu0 %827, %v320_v22   ;;  %v395_v29 = vld [vmem:[%s1105_s6 + $0x30] sm:$0xff]  ;;  %v394_v30 = vld [vmem:[%s1105_s6 + $0x28] sm:$0xff]  ;;  %s671_s8 = sshll.u32 %s888_s18, 4  ;;  %s672_s8 = int_to_ptr.vmem [resolvable:$true] %s671_s8 }
  0x13   :  { %337 = vperm.xlu1 %828, %v319_v23   ;;  %v396_v28 = vld [vmem:[%s1105_s6 + $0x38] sm:$0xff]  ;;  %v393_v31 = vld [vmem:[%s1105_s6 + $0x20] sm:$0xff]  ;;  %v391_v33 = vld [vmem:[%s1105_s6 + $0x10] sm:$0xff]  ;;  %s867_s19 = scalar_lea.vmem %s672_s8, 32  ;;  %p868_p1 = scmp.lt.s32.totalorder %s672_s8, %s672_s8 }
  0x14   :  { %760 = vmatmul.mubr.msk.f32.gmra.mxu0 %vm53_vm1, %v51_v24  ;;  %774 = vmatmul.mubr.msk.f32.gmra.mxu1 %vm187_vm2, %v42_v25  ;;  %v392_v32 = vld [vmem:[%s1105_s6 + $0x18] sm:$0xff]  ;;  %v390_v34 = vld [vmem:[%s1105_s6 + $0x8] sm:$0xff]  ;;  %v389_v35 = vld [vmem:[%s1105_s6] sm:$0xff] }
  0x15   :  { %v576_v36 = vld [vmem:[#allocation2] sm:$0x1]  ;;  %v382_v22 = vld [vmem:[%s1104_s5 + $0x8] sm:$0xff]  ;;  %v383_v23 = vld [vmem:[%s1104_s5 + $0x10] sm:$0xff] }
  0x16   :  { %332 = vperm.xlu0 %827, %v318_v26   ;;  %v381_v37 = vld [vmem:[%s1104_s5] sm:$0xff]  ;;  %v384_v24 = vld [vmem:[%s1104_s5 + $0x18] sm:$0xff]  ;;  %v386_v26 = vld [vmem:[%s1104_s5 + $0x28] sm:$0xff] }
  0x17   :  { %327 = vperm.xlu1 %828, %v317_v27   ;;  %792 = vmatprep.mubr.msk.f32.mxu0 %vm437_vm3, %v381_v37  ;;  %v385_v25 = vld [vmem:[%s1104_s5 + $0x20] sm:$0xff]  ;;  %v387_v27 = vld [vmem:[%s1104_s5 + $0x30] sm:$0xff] }
  0x1a   :  { %434 = vperm.xlu0 %827, %v396_v28   ;;  %v388_v28 = vld [vmem:[%s1104_s5 + $0x38] sm:$0xff] }
  0x1b   :  { %429 = vperm.xlu1 %828, %v395_v29   ;;  %v886_v29 = vmov 0.0  }
  0x1c   :  { %804 = vmatprep.subr.mxu1 %v886_v29  ;;  %820 = vmatprep.mubr.msk.f32.mxu1 %vm887_vm4, %v886_v29 }
  0x1e   :  { %424 = vperm.xlu0 %827, %v394_v30  }
  0x1f   :  { %419 = vperm.xlu1 %828, %v393_v31  }
  0x22   :  { %414 = vperm.xlu0 %827, %v392_v32  }
  0x23   :  { %409 = vperm.xlu1 %828, %v391_v33  }
  0x26   :  { %404 = vperm.xlu0 %827, %v390_v34  }
  0x27   :  { %399 = vperm.xlu1 %828, %v389_v35  }
  0x2a   :  { %579 = vperm.xlu0 %827, %v576_v36  }
  0x85   :  { %v363_v44 = vpop.permute.xlu0 %362 }
  0x86   :  { %v353_v47 = vpop.permute.xlu1 %352 }
  0x89   :  { %v358_v52 = vpop.permute.xlu0 %357 }
  0x8a   :  { %v348_v55 = vpop.permute.xlu1 %347 }
  0x8d   :  { %v343_v2 = vpop.permute.xlu0 %342 }
  0x8e   :  { %v338_v5 = vpop.permute.xlu1 %337 }
  0x91   :  { %v333_v10 = vpop.permute.xlu0 %332 }
  0x92   :  { %v328_v12 = vpop.permute.xlu1 %327 }
  0x95   :  { %v435_v32 = vpop.permute.xlu0 %434 }
  0x96   :  { %v430_v34 = vpop.permute.xlu1 %429 }
  0x99   :  { %v425_v37 = vpop.permute.xlu0 %424 }
  0xc7   :  { %v752_v38 = vpop.f32.mrf.mxu0 }
  0xc8   :  { %v766_v39 = vpop.f32.mrf.mxu1 }
  0xc9   :  { %v148_v40 = vpop.f32.mrf.mxu0  ;;  %v284_v6 = vadd.f32 %v766_v39, %v752_v38  ;;  %v420_v39 = vpop.permute.xlu1 %419 }
  0xca   :  { %v278_v41 = vpop.f32.mrf.mxu1 }
  0xcb   :  { %v755_v42 = vpop.f32.mrf.mxu0  ;;  %v279_v8 = vadd.f32 %v278_v41, %v148_v40  ;;  %v366_v11 = vadd.f32 %v333_v10, %v284_v6 }
  0xcc   :  { %v769_v43 = vpop.f32.mrf.mxu1 }
  0xcd   :  { %v158_v45 = vpop.f32.mrf.mxu0  ;;  %v294_v63 = vadd.f32 %v769_v43, %v755_v42  ;;  %v365_v13 = vadd.f32 %v328_v12, %v279_v8 }
  0xce   :  { %v288_v46 = vpop.f32.mrf.mxu1 }
  0xcf   :  { %v289_v3 = vadd.f32 %v288_v46, %v158_v45  ;;  %v368_v7 = vadd.f32 %v343_v2, %v294_v63  ;;  %v415_v45 = vpop.permute.xlu0 %414  ;;  %v582_v63 = vlaneseq }
  0xd0   :  { %v758_v48 = vpop.f32.mrf.mxu0  ;;  %v772_v49 = vpop.f32.mrf.mxu1 }
  0xd1   :  { %v304_v56 = vadd.f32 %v772_v49, %v758_v48  ;;  %v367_v9 = vadd.f32 %v338_v5, %v289_v3 }
  0xd2   :  { %v168_v50 = vpop.f32.mrf.mxu0  ;;  %v298_v51 = vpop.f32.mrf.mxu1 }
  0xd3   :  { %v299_v60 = vadd.f32 %v298_v51, %v168_v50  ;;  %v370_v0 = vadd.f32 %v353_v47, %v304_v56  ;;  %v410_v47 = vpop.permute.xlu1 %409  ;;  %v405_v50 = vpop.permute.xlu0 %404 }
  0xd4   :  { %v761_v53 = vpop.f32.mrf.mxu0  ;;  %v775_v54 = vpop.f32.mrf.mxu1 }
  0xd5   :  { %v314_v57 = vadd.f32 %v775_v54, %v761_v53  ;;  %v369_v4 = vadd.f32 %v348_v55, %v299_v60 }
  0xd6   :  { %v178_v58 = vpop.f32.mrf.mxu0  ;;  %v308_v59 = vpop.f32.mrf.mxu1 }
  0xd7   :  { %v372_v61 = vadd.f32 %v363_v44, %v314_v57  ;;  %v309_v62 = vadd.f32 %v308_v59, %v178_v58  ;;  %v580_v2 = vpop.permute.xlu0 %579 }
  0xd9   :  { %829 = vtanh.f32 %v372_v61  ;;  %v371_v1 = vadd.f32 %v358_v52, %v309_v62  ;;  %v400_v52 = vpop.permute.xlu1 %399  ;;  %v575_v61 = vld [vmem:[%s1106_s7] sm:$0x1]  ;;  %s863_s7 = scalar_lea.vmem %s672_s8, 16 }
  0xda   :  { %p864_p0 = scmp.ne.s32.totalorder %s672_s8, %s863_s7  ;;  %p869_p2 = scmp.lt.s32.totalorder %s867_s19, %s863_s7 }
  0xdb   :  { %831 = vtanh.f32 %v371_v1 }
  0xdc   :  { %833 = vtanh.f32 %v370_v0  ;;  %v583_v0 = vshrl.u32 %v582_v63, 7  ;;  %p870_p3 = por %p869_p2, %p868_p1 }
  0xdd   :  { %835 = vtanh.f32 %v369_v4 }
  0xde   :  { %837 = vtanh.f32 %v368_v7  ;;  %v584_v1 = vsub.s32 0, %v583_v0  ;;  %p871_p4 = pnand %p870_p3, %p864_p0 }
  0xdf   :  { %839 = vtanh.f32 %v367_v9 }
  0xe0   :  { %841 = vtanh.f32 %v366_v11  ;;  %v585_v3 = vrot.slane %v580_v2, %v584_v1 }
  0xe1   :  { %843 = vtanh.f32 %v365_v13 }
  0xe6   :  { %v830_v14 = vpop.eup %829 }
  0xe7   :  { %776 = vmatprep.subr.mxu0 %v830_v14 }
  0xe8   :  { %v832_v15 = vpop.eup %831  ;;  %777 = vmatpush3.msra.mxu0 %v830_v14 }
  0xe9   :  { %778 = vmatprep.subr.mxu0 %v832_v15  ;;  %v834_v16 = vpop.eup %833 }
  0xea   :  { %779 = vmatpush3.msra.mxu0 %v832_v15  ;;  %v836_v17 = vpop.eup %835 }
  0xeb   :  { %780 = vmatprep.subr.mxu0 %v834_v16  ;;  %v838_v18 = vpop.eup %837 }
  0xec   :  { %781 = vmatpush3.msra.mxu0 %v834_v16  ;;  %v840_v19 = vpop.eup %839 }
  0xed   :  { %782 = vmatprep.subr.mxu0 %v836_v17  ;;  %v842_v20 = vpop.eup %841 }
  0xee   :  { %783 = vmatpush3.msra.mxu0 %v836_v17  ;;  %v844_v21 = vpop.eup %843 }
  0xef   :  { %784 = vmatprep.subr.mxu0 %v838_v18 }
  0xf0   :  { %785 = vmatpush3.msra.mxu0 %v838_v18 }
  0xf1   :  { %786 = vmatprep.subr.mxu0 %v840_v19 }
  0xf2   :  { %787 = vmatpush3.msra.mxu0 %v840_v19 }
  0xf3   :  { %788 = vmatprep.subr.mxu0 %v842_v20 }
  0xf4   :  { %789 = vmatpush3.msra.mxu0 %v842_v20 }
  0xf5   :  { %790 = vmatprep.subr.mxu0 %v844_v21 }
  0xf6   :  { %791 = vmatpush3.msra.mxu0 %v844_v21 }
  0xf7   :  { %793 = vmatmul.mubr.msk.f32.vlgmr.msra.gmra.mxu0 %vm437_vm3, %v382_v22 }
  0xf8   :  { %795 = vmatprep.mubr.msk.f32.mxu0 %vm437_vm3, %v383_v23 }
  0xfb   :  { %796 = vmatmul.mubr.msk.f32.gmra.mxu0 %vm437_vm3, %v384_v24 }
  0xfc   :  { %798 = vmatprep.mubr.msk.f32.mxu0 %vm437_vm3, %v385_v25 }
  0xff   :  { %799 = vmatmul.mubr.msk.f32.gmra.mxu0 %vm437_vm3, %v386_v26 }
 0x100   :  { %801 = vmatprep.mubr.msk.f32.mxu0 %vm437_vm3, %v387_v27 }
 0x103   :  { %802 = vmatmul.mubr.msk.f32.gmra.mxu0 %vm437_vm3, %v388_v28 }
 0x1b7   :  { %v794_v30 = vpop.f32.mrf.mxu0 }
 0x1b8   :  { %v534_v51 = vadd.f32 %v794_v30, %v405_v50 }
 0x1b9   :  { %v528_v31 = vpop.f32.mrf.mxu0 }
 0x1ba   :  { %v529_v53 = vadd.f32 %v528_v31, %v400_v52 }
 0x1bb   :  { %v797_v33 = vpop.f32.mrf.mxu0 }
 0x1bc   :  { %v544_v48 = vadd.f32 %v797_v33, %v415_v45 }
 0x1bd   :  { %v538_v35 = vpop.f32.mrf.mxu0 }
 0x1be   :  { %v539_v49 = vadd.f32 %v538_v35, %v410_v47 }
 0x1bf   :  { %v800_v36 = vpop.f32.mrf.mxu0 }
 0x1c0   :  { %v554_v43 = vadd.f32 %v800_v36, %v425_v37 }
 0x1c1   :  { %v548_v38 = vpop.f32.mrf.mxu0 }
 0x1c2   :  { %v549_v46 = vadd.f32 %v548_v38, %v420_v39 }
 0x1c3   :  { %v803_v40 = vpop.f32.mrf.mxu0 }
 0x1c4   :  { %v564_v41 = vadd.f32 %v803_v40, %v435_v32 }
 0x1c5   :  { %v558_v42 = vpop.f32.mrf.mxu0 }
 0x1c6   :  { %845 = vtanh.f32 %v564_v41  ;;  %v559_v44 = vadd.f32 %v558_v42, %v430_v34 }
 0x1c8   :  { %847 = vtanh.f32 %v559_v44 }
 0x1c9   :  { %849 = vtanh.f32 %v554_v43 }
 0x1ca   :  { %851 = vtanh.f32 %v549_v46 }
 0x1cb   :  { %853 = vtanh.f32 %v544_v48 }
 0x1cc   :  { %855 = vtanh.f32 %v539_v49 }
 0x1cd   :  { %857 = vtanh.f32 %v534_v51 }
 0x1ce   :  { %859 = vtanh.f32 %v529_v53 }
 0x1d3   :  { %v846_v54 = vpop.eup %845 }
 0x1d4   :  { %805 = vmatpush3.msra.mxu1 %v846_v54 }
 0x1d5   :  { %v848_v55 = vpop.eup %847  ;;  %806 = vmatprep.subr.mxu1 %v886_v29 }
 0x1d6   :  { %807 = vmatpush3.msra.mxu1 %v848_v55  ;;  %v850_v56 = vpop.eup %849 }
 0x1d7   :  { %808 = vmatprep.subr.mxu1 %v886_v29  ;;  %v852_v57 = vpop.eup %851 }
 0x1d8   :  { %809 = vmatpush3.msra.mxu1 %v850_v56  ;;  %v854_v58 = vpop.eup %853 }
 0x1d9   :  { %810 = vmatprep.subr.mxu1 %v886_v29  ;;  %v856_v59 = vpop.eup %855 }
 0x1da   :  { %811 = vmatpush3.msra.mxu1 %v852_v57  ;;  %v858_v60 = vpop.eup %857 }
 0x1db   :  { %812 = vmatprep.subr.mxu1 %v886_v29  ;;  %v860_v62 = vpop.eup %859 }
 0x1dc   :  { %813 = vmatpush3.msra.mxu1 %v854_v58 }
 0x1dd   :  { %814 = vmatprep.subr.mxu1 %v886_v29 }
 0x1de   :  { %815 = vmatpush3.msra.mxu1 %v856_v59 }
 0x1df   :  { %816 = vmatprep.subr.mxu1 %v886_v29 }
 0x1e0   :  { %817 = vmatpush3.msra.mxu1 %v858_v60 }
 0x1e1   :  { %818 = vmatprep.subr.mxu1 %v886_v29 }
 0x1e2   :  { %819 = vmatpush3.msra.mxu1 %v860_v62 }
 0x1e3   :  { %821 = vmatmul.mubr.msk.f32.vlgmr.msra.gmra.mxu1 %vm437_vm3, %v575_v61 }
 0x2a3   :  { %v655_v4 = vpop.f32.mrf.mxu1 }
 0x2a4   :  { %v656_v5 = vadd.f32 %v655_v4, %v585_v3 }
 0x2a5   :  { %v822_v6 = vpop.f32.mrf.mxu1 }
 0x2a6   :  { %v659_v7 = vmul.f32 0.5, %v656_v5 }
 0x2a8   :  { %861 = vtanh.f32 %v659_v7 }
 0x2b5   :  { %v862_v8 = vpop.eup %861 }
 0x2b6   :  { %v661_v9 = vadd.f32 1.0, %v862_v8 }
 0x2b8   :  { %v662_v10 = vmul.f32 0.5, %v661_v9 }
 0x2ba   :  { %664 = vst.msk [vmem:[#allocation3] sm:$0x1] %vm663_vm5, %v662_v10 }
 0x2bb   :  { %874 = shalt.err (!%p871_p4)
}
 0x2bc   :  { %674 = dma.vmem_to_hbm [thread:$0]  %s672_s8, 16, %s1108_s9, [#allocation4]  }
 0x2bd   :  { %883 = dma.done.wait [#allocation4], 16  }
 0x2be   :  { %884 = vsyncadd [#allocation4], 4294967280 }
 0x2bf   :  { %678 = vsyncpa [#allocation4], 1 }

</bundles_post_ra>
